<compile_context>
chip_gen: v6e
topology: v6e:2x2x1
jax: 0.10.0
libtpu: 0.0.40
codegen_flags: <defaults>
</compile_context>

<pallas_src>
from functools import partial

import jax
import jax.numpy as jnp
from jax.experimental import pallas as pl
from jax.experimental.pallas import tpu as pltpu


LANE = 128     # TPU lane width; hidden and output are padded to this.
MAX_TB = 2048  # cap on batch-tile rows (keeps double-buffered VMEM tiny)


def _round_up(x, m):
    return ((x + m - 1) // m) * m


def _tensorcores_per_chip():
    # v7x exposes 2 TensorCores per chip (megacore); v5e / v6e have 1.
    try:
        kind = jax.devices()[0].device_kind.lower()
    except Exception:
        return 1
    return 2 if ("v7" in kind or "tpu7" in kind) else 1


NUM_TC = _tensorcores_per_chip()


def dqn_kernel(x_ref, w1_ref, w2_ref, b2_ref, out_ref):
    # x:  (tb, IN_PAD)   one batch tile; column `in_features` is the constant-1
    #                    bias column, remaining pad columns are zero.
    # w1: (IN_PAD, 128)  layer-1 weights with b1 folded in as an extra row.
    # w2: (128, 128)     layer-2 weights (hidden & n_actions zero-padded).
    # b2: (1, 128)       layer-2 bias (zero-padded).
    h = jnp.tanh(jnp.dot(x_ref[...], w1_ref[...],
                         preferred_element_type=jnp.float32))
    q = jnp.dot(h, w2_ref[...], preferred_element_type=jnp.float32) + b2_ref[...]
    out_ref[...] = q.astype(out_ref.dtype)  # lane-dense (tb, 128) store


def _pick_batch_tile(B):
    if NUM_TC >= 2 and B >= 16:
        # Exactly two balanced tiles -> both v7x TensorCores are busy.
        return min(_round_up(pl.cdiv(B, 2), 8), MAX_TB)
    # Single TensorCore: one grid step whenever the batch fits the cap.
    return max(8, min(_round_up(B, 8), MAX_TB))


def _dqn_forward_impl(x, w1p, w2p, b2p, n_actions):
    B, in_features = x.shape
    in_pad, H = w1p.shape          # (8, 128)
    NOUT = w2p.shape[1]            # 128 (lane-dense output slab)

    tb = _pick_batch_tile(B)
    b_pad = _round_up(B, tb)

    # Pad batch rows and feature columns, then write the constant-1 bias
    # column (folds b1 into the layer-1 matmul).  Fuses into the one dispatch.
    xp = jnp.pad(x, ((0, b_pad - B), (0, in_pad - in_features)))
    xp = xp.at[:, in_features].set(1.0)

    grid = (b_pad // tb,)
    cost = pl.CostEstimate(
        flops=2 * b_pad * (in_pad * H + H * NOUT),
        transcendentals=b_pad * H,
        bytes_accessed=4 * (b_pad * in_pad + b_pad * NOUT
                            + in_pad * H + H * NOUT + NOUT),
    )

    q_pad = pl.pallas_call(
        dqn_kernel,
        out_shape=jax.ShapeDtypeStruct((b_pad, NOUT), jnp.float32),
        grid=grid,
        in_specs=[
            pl.BlockSpec((tb, in_pad), lambda i: (i, 0)),   # streamed x tile
            pl.BlockSpec((in_pad, H), lambda i: (0, 0)),    # resident weights
            pl.BlockSpec((H, NOUT), lambda i: (0, 0)),      # resident weights
            pl.BlockSpec((1, NOUT), lambda i: (0, 0)),      # resident bias
        ],
        out_specs=pl.BlockSpec((tb, NOUT), lambda i: (i, 0)),
        compiler_params=pltpu.CompilerParams(
            dimension_semantics=("parallel",)),
        cost_estimate=cost,
    )(xp, w1p, w2p, b2p)

    # TODO(synk): for very large evaluation batches, emit a bf16 slab or fuse
    # the argmax / q[action] gather into the kernel epilogue to cut writeback.
    return q_pad[:B, :n_actions]


_dqn_forward_jit = jax.jit(_dqn_forward_impl, static_argnames=("n_actions",))


@partial(jax.jit, static_argnames=("n_actions",))
def _dqn_act_jit(x, w1p, w2p, b2p, n_actions):
    q = _dqn_forward_impl(x, w1p, w2p, b2p, n_actions)
    return jnp.argmax(q, axis=1)


def dqn_forward(x, params):
    """x: (B, in_features) f32.  Returns q-values (B, n_actions) f32."""
    w1p, w2p, b2p, n_actions = params
    return _dqn_forward_jit(x, w1p, w2p, b2p, n_actions=n_actions)


def dqn_act(observation, params):
    """Greedy action(s); accepts a single (in_features,) obs or a batch."""
    w1p, w2p, b2p, n_actions = params
    obs = jnp.asarray(observation, jnp.float32)
    squeeze = obs.ndim == 1
    if squeeze:
        obs = obs[None, :]
    a = _dqn_act_jit(obs, w1p, w2p, b2p, n_actions=n_actions)
    return a[0] if squeeze else a


def init_dqn_params(key, in_features, hidden, n_actions):
    """PyTorch nn.Linear default init: U(-1/sqrt(fan_in), 1/sqrt(fan_in))."""
    k1, k2, k3, k4 = jax.random.split(key, 4)
    bound1 = 1.0 / jnp.sqrt(in_features)
    bound2 = 1.0 / jnp.sqrt(hidden)
    w1 = jax.random.uniform(k1, (in_features, hidden), jnp.float32, -bound1, bound1)
    b1 = jax.random.uniform(k2, (hidden,), jnp.float32, -bound1, bound1)
    w2 = jax.random.uniform(k3, (hidden, n_actions), jnp.float32, -bound2, bound2)
    b2 = jax.random.uniform(k4, (n_actions,), jnp.float32, -bound2, bound2)
    return w1, b1, w2, b2


def prepare_dqn_params(w1, b1, w2, b2):
    """One-time layout work: pad to lane-dense shapes and fold b1 into w1.

    in_features -> round_up(in_features + 1, 8) (the extra row holds b1 and is
    hit by the constant-1 column appended to x); hidden -> 128; n_actions ->
    128.  Zero padding is exact: padded hidden units give tanh(0) = 0 and
    padded output lanes are sliced off inside the jit.
    """
    in_features, hidden = w1.shape
    n_actions = w2.shape[1]
    in_pad = _round_up(in_features + 1, 8)
    h_pad = _round_up(max(hidden, LANE), LANE)
    a_pad = _round_up(max(n_actions, LANE), LANE)

    w1p = jnp.zeros((in_pad, h_pad), jnp.float32)
    w1p = w1p.at[:in_features, :hidden].set(w1)
    w1p = w1p.at[in_features, :hidden].set(jnp.reshape(b1, (-1,)))
    w2p = jnp.zeros((h_pad, a_pad), jnp.float32).at[:hidden, :n_actions].set(w2)
    b2p = jnp.zeros((1, a_pad), jnp.float32).at[0, :n_actions].set(jnp.reshape(b2, (-1,)))
    return (w1p, w2p, b2p, n_actions)


if __name__ == "__main__":
    import numpy as np

    # CartPole-v1: observation_space.shape = (4,), action_space.n = 2.
    # Replay-minibatch-sized batch so the single dispatch is amortized.
    in_features, hidden, n_actions = 4, 64, 2
    batch = 256

    key = jax.random.PRNGKey(0)
    k_params, k_x = jax.random.split(key)
    w1, b1, w2, b2 = init_dqn_params(k_params, in_features, hidden, n_actions)
    params = prepare_dqn_params(w1, b1, w2, b2)  # padded once, reused per call
    x = jax.random.normal(k_x, (batch, in_features), jnp.float32)

    q = jax.block_until_ready(dqn_forward(x, params))
    assert q.shape == (batch, n_actions)

    # Exact-math reference in float64 on the host.  Tolerance covers the fact
    # that TPU f32 matmuls may use bf16 MXU passes by default.
    xn = np.asarray(x, np.float64)
    ref = np.tanh(xn @ np.asarray(w1, np.float64) + np.asarray(b1, np.float64))
    ref = ref @ np.asarray(w2, np.float64) + np.asarray(b2, np.float64)
    assert np.allclose(np.asarray(q, np.float64), ref, atol=1e-2, rtol=1e-2)

    # Single-observation act() path (B=1) must agree with the batched forward.
    a0 = jax.block_until_ready(dqn_act(np.asarray(x[0]), params))
    assert 0 <= int(a0) < n_actions
    assert int(a0) == int(jnp.argmax(q[0]))

    q1 = jax.block_until_ready(dqn_forward(x[:1], params))
    assert np.allclose(np.asarray(q1, np.float64), ref[:1], atol=1e-2, rtol=1e-2)

    print("KERNEL_OK")
</pallas_src>

<mosaic_0001>
module attributes {stable_mosaic.version = 11 : i64} {
  func.func @dqn_kernel(%arg0: i32, %arg1: memref<256x8xf32, #tpu.memory_space<vmem>>, %arg2: memref<8x128xf32, #tpu.memory_space<vmem>>, %arg3: memref<128x128xf32, #tpu.memory_space<vmem>>, %arg4: memref<1x128xf32, #tpu.memory_space<vmem>>, %arg5: memref<256x128xf32, #tpu.memory_space<vmem>>) attributes {dimension_semantics = [#tpu.dimension_semantics<parallel>], iteration_bounds = array<i64: 1>, scalar_prefetch = 0 : i64, scratch_operands = 0 : i64, tpu.core_type = #tpu.core_type<tc>, window_params = [{transform_indices = @transform_0, window_bounds = array<i64: 256, 8>}, {pipeline_mode = #tpu.pipeline_mode<synchronous>, transform_indices = @transform_1, window_bounds = array<i64: 8, 128>}, {pipeline_mode = #tpu.pipeline_mode<synchronous>, transform_indices = @transform_2, window_bounds = array<i64: 128, 128>}, {pipeline_mode = #tpu.pipeline_mode<synchronous>, transform_indices = @transform_3, window_bounds = array<i64: 1, 128>}, {transform_indices = @transform_4, window_bounds = array<i64: 256, 128>}]} {
    %c0 = arith.constant 0 : index
    %c0_0 = arith.constant 0 : index
    %0 = vector.load %arg1[%c0, %c0_0] : memref<256x8xf32, #tpu.memory_space<vmem>>, vector<256x8xf32>
    %c0_1 = arith.constant 0 : index
    %c0_2 = arith.constant 0 : index
    %1 = vector.load %arg2[%c0_1, %c0_2] : memref<8x128xf32, #tpu.memory_space<vmem>>, vector<8x128xf32>
    %cst = arith.constant dense<0.000000e+00> : vector<256x128xf32>
    %2 = tpu.matmul %0, %1, %cst {dimension_numbers = #tpu.dot_dimension_numbers<[1], [0], [0], [1], [0, 0, 1, 1], [], []>} : vector<256x8xf32>, vector<8x128xf32>, vector<256x128xf32> -> vector<256x128xf32>
    %3 = math.tanh %2 : vector<256x128xf32>
    %c0_3 = arith.constant 0 : index
    %c0_4 = arith.constant 0 : index
    %4 = vector.load %arg3[%c0_3, %c0_4] : memref<128x128xf32, #tpu.memory_space<vmem>>, vector<128x128xf32>
    %cst_5 = arith.constant dense<0.000000e+00> : vector<256x128xf32>
    %5 = tpu.matmul %3, %4, %cst_5 {dimension_numbers = #tpu.dot_dimension_numbers<[1], [0], [0], [1], [0, 0, 1, 1], [], []>} : vector<256x128xf32>, vector<128x128xf32>, vector<256x128xf32> -> vector<256x128xf32>
    %c0_6 = arith.constant 0 : index
    %c0_7 = arith.constant 0 : index
    %6 = vector.load %arg4[%c0_6, %c0_7] : memref<1x128xf32, #tpu.memory_space<vmem>>, vector<1x128xf32>
    %7 = vector.broadcast %6 : vector<1x128xf32> to vector<256x128xf32>
    %8 = arith.addf %5, %7 : vector<256x128xf32>
    %c0_8 = arith.constant 0 : index
    %c0_9 = arith.constant 0 : index
    %9 = vector.load %arg5[%c0_8, %c0_9] : memref<256x128xf32, #tpu.memory_space<vmem>>, vector<256x128xf32>
    tpu.vector_store %arg5[%c0_8, %c0_9], %8 {strides = array<i32>} : memref<256x128xf32, #tpu.memory_space<vmem>>, vector<256x128xf32>,
    return
  }
  func.func @transform_0(%arg0: i32) -> (i32, i32) {
    %c0_i32 = arith.constant 0 : i32
    %c0_i32_0 = arith.constant 0 : i32
    return %arg0, %c0_i32 : i32, i32
  }
  func.func @transform_1(%arg0: i32) -> (i32, i32) {
    %c0_i32 = arith.constant 0 : i32
    %c0_i32_0 = arith.constant 0 : i32
    %c0_i32_1 = arith.constant 0 : i32
    return %c0_i32, %c0_i32_0 : i32, i32
  }
  func.func @transform_2(%arg0: i32) -> (i32, i32) {
    %c0_i32 = arith.constant 0 : i32
    %c0_i32_0 = arith.constant 0 : i32
    %c0_i32_1 = arith.constant 0 : i32
    return %c0_i32, %c0_i32_0 : i32, i32
  }
  func.func @transform_3(%arg0: i32) -> (i32, i32) {
    %c0_i32 = arith.constant 0 : i32
    %c0_i32_0 = arith.constant 0 : i32
    %c0_i32_1 = arith.constant 0 : i32
    return %c0_i32, %c0_i32_0 : i32, i32
  }
  func.func @transform_4(%arg0: i32) -> (i32, i32) {
    %c0_i32 = arith.constant 0 : i32
    %c0_i32_0 = arith.constant 0 : i32
    return %arg0, %c0_i32 : i32, i32
  }
}

</mosaic_0001>

<bundles_post_ra>
// kernel: _dqn_forward_impl.1
= control target key start
LH: loop header
LB: loop body
LE: loop exit
PB: predicated region body
PF: predicated region fallthrough
CT: control target
= control target key end

     0   :  { %vm50_vm0 = vcmask 64512   ;;  %s1365_s1 = inlined_call_operand.vmem [shape: f32[8,128], index: 1, kind: input, shape index: {}]   ;;  %s1366_s0 = inlined_call_operand.vmem [shape: f32[256,8], index: 0, kind: input, shape index: {}]   ;;  %s1367_s2 = inlined_call_operand.vmem [shape: f32[128,128], index: 2, kind: input, shape index: {}]   ;;  %s1368_s3 = inlined_call_operand.vmem [shape: f32[1,128], index: 3, kind: input, shape index: {}]   ;;  %s1369_s4 = inlined_call_operand.vmem [shape: f32[256,128], index: 4, kind: output, shape index: {}]  }
   0x1   :  { %v49_v0 = vld [vmem:[%s1365_s1] sm:$0xff]  ;;  %v18_v2 = vld [vmem:[%s1366_s0 + $0x8] sm:$0xff]  ;;  %v19_v3 = vld [vmem:[%s1366_s0 + $0x10] sm:$0xff] }
   0x2   :  { %v17_v1 = vld [vmem:[%s1366_s0] sm:$0xff]  ;;  %802 = vmatprep.subr.mxu0 %v49_v0  ;;  %v20_v4 = vld [vmem:[%s1366_s0 + $0x18] sm:$0xff]  ;;  %v22_v6 = vld [vmem:[%s1366_s0 + $0x28] sm:$0xff] }
   0x3   :  { %804 = vmatprep.mubr.msk.f32.mxu0 %vm50_vm0, %v17_v1  ;;  %803 = vmatpush3.msra.mxu0 %v49_v0  ;;  %v21_v5 = vld [vmem:[%s1366_s0 + $0x20] sm:$0xff]  ;;  %v23_v7 = vld [vmem:[%s1366_s0 + $0x30] sm:$0xff]  ;;  %v419_v8 = vld [vmem:[%s1367_s2 + $0x78] sm:$0xff] }
   0x4   :  { %805 = vmatmul.mubr.msk.f32.vlgmr.msra.gmra.mxu0 %vm50_vm0, %v18_v2  ;;  %v418_v9 = vld [vmem:[%s1367_s2 + $0x70] sm:$0xff]  ;;  %v24_v10 = vld [vmem:[%s1366_s0 + $0x38] sm:$0xff]  ;;  %852 = vmatprep.subr.mxu0 %v419_v8  ;;  %v25_v11 = vld [vmem:[%s1366_s0 + $0x40] sm:$0xff] }
   0x5   :  { %807 = vmatprep.mubr.msk.f32.mxu0 %vm50_vm0, %v19_v3  ;;  %853 = vmatpush3.msra.mxu0 %v419_v8  ;;  %v417_v12 = vld [vmem:[%s1367_s2 + $0x68] sm:$0xff]  ;;  %v416_v14 = vld [vmem:[%s1367_s2 + $0x60] sm:$0xff]  ;;  %v27_v15 = vld [vmem:[%s1366_s0 + $0x50] sm:$0xff] }
   0x6   :  { %932 = vmatprep.subr.mxu1 %v419_v8  ;;  %854 = vmatprep.subr.mxu0 %v418_v9  ;;  %v26_v13 = vld [vmem:[%s1366_s0 + $0x48] sm:$0xff]  ;;  %v415_v16 = vld [vmem:[%s1367_s2 + $0x58] sm:$0xff]  ;;  %v414_v18 = vld [vmem:[%s1367_s2 + $0x50] sm:$0xff] }
   0x7   :  { %948 = vmatpush3.msra.mxu1 %v419_v8  ;;  %855 = vmatpush3.msra.mxu0 %v418_v9  ;;  %v28_v17 = vld [vmem:[%s1366_s0 + $0x58] sm:$0xff]  ;;  %v29_v19 = vld [vmem:[%s1366_s0 + $0x60] sm:$0xff]  ;;  %v413_v20 = vld [vmem:[%s1367_s2 + $0x48] sm:$0xff] }
   0x8   :  { %808 = vmatmul.mubr.msk.f32.gmra.mxu0 %vm50_vm0, %v20_v4  ;;  %933 = vmatprep.subr.mxu1 %v418_v9  ;;  %v30_v21 = vld [vmem:[%s1366_s0 + $0x68] sm:$0xff]  ;;  %v31_v22 = vld [vmem:[%s1366_s0 + $0x70] sm:$0xff]  ;;  %v32_v23 = vld [vmem:[%s1366_s0 + $0x78] sm:$0xff] }
   0x9   :  { %810 = vmatprep.mubr.msk.f32.mxu0 %vm50_vm0, %v21_v5  ;;  %856 = vmatprep.subr.mxu0 %v417_v12  ;;  %v33_v24 = vld [vmem:[%s1366_s0 + $0x80] sm:$0xff]  ;;  %v34_v25 = vld [vmem:[%s1366_s0 + $0x88] sm:$0xff]  ;;  %v35_v26 = vld [vmem:[%s1366_s0 + $0x90] sm:$0xff] }
   0xa   :  { %949 = vmatpush3.msra.mxu1 %v418_v9  ;;  %857 = vmatpush3.msra.mxu0 %v417_v12  ;;  %v36_v27 = vld [vmem:[%s1366_s0 + $0x98] sm:$0xff]  ;;  %v37_v28 = vld [vmem:[%s1366_s0 + $0xa0] sm:$0xff]  ;;  %v38_v29 = vld [vmem:[%s1366_s0 + $0xa8] sm:$0xff] }
   0xb   :  { %934 = vmatprep.subr.mxu1 %v417_v12  ;;  %858 = vmatprep.subr.mxu0 %v416_v14  ;;  %v39_v30 = vld [vmem:[%s1366_s0 + $0xb0] sm:$0xff]  ;;  %v40_v31 = vld [vmem:[%s1366_s0 + $0xb8] sm:$0xff]  ;;  %v41_v32 = vld [vmem:[%s1366_s0 + $0xc0] sm:$0xff] }
   0xc   :  { %811 = vmatmul.mubr.msk.f32.gmra.mxu0 %vm50_vm0, %v22_v6  ;;  %950 = vmatpush3.msra.mxu1 %v417_v12  ;;  %v42_v33 = vld [vmem:[%s1366_s0 + $0xc8] sm:$0xff]  ;;  %v43_v34 = vld [vmem:[%s1366_s0 + $0xd0] sm:$0xff]  ;;  %v44_v35 = vld [vmem:[%s1366_s0 + $0xd8] sm:$0xff] }
   0xd   :  { %813 = vmatprep.mubr.msk.f32.mxu0 %vm50_vm0, %v23_v7  ;;  %859 = vmatpush3.msra.mxu0 %v416_v14  ;;  %v45_v36 = vld [vmem:[%s1366_s0 + $0xe0] sm:$0xff]  ;;  %v46_v37 = vld [vmem:[%s1366_s0 + $0xe8] sm:$0xff]  ;;  %v47_v38 = vld [vmem:[%s1366_s0 + $0xf0] sm:$0xff] }
   0xe   :  { %860 = vmatprep.subr.mxu0 %v415_v16  ;;  %935 = vmatprep.subr.mxu1 %v416_v14  ;;  %v48_v39 = vld [vmem:[%s1366_s0 + $0xf8] sm:$0xff]  ;;  %v412_v40 = vld [vmem:[%s1367_s2 + $0x40] sm:$0xff]  ;;  %v410_v42 = vld [vmem:[%s1367_s2 + $0x30] sm:$0xff] }
   0xf   :  { %861 = vmatpush3.msra.mxu0 %v415_v16  ;;  %951 = vmatpush3.msra.mxu1 %v416_v14  ;;  %v411_v41 = vld [vmem:[%s1367_s2 + $0x38] sm:$0xff]  ;;  %v409_v43 = vld [vmem:[%s1367_s2 + $0x28] sm:$0xff]  ;;  %v408_v44 = vld [vmem:[%s1367_s2 + $0x20] sm:$0xff] }
  0x10   :  { %814 = vmatmul.mubr.msk.f32.gmra.mxu0 %vm50_vm0, %v24_v10  ;;  %862 = vmatprep.subr.mxu0 %v414_v18  ;;  %v407_v45 = vld [vmem:[%s1367_s2 + $0x18] sm:$0xff]  ;;  %v406_v46 = vld [vmem:[%s1367_s2 + $0x10] sm:$0xff]  ;;  %v405_v47 = vld [vmem:[%s1367_s2 + $0x8] sm:$0xff] }
  0x11   :  { %816 = vmatprep.mubr.msk.f32.mxu0 %vm50_vm0, %v25_v11  ;;  %863 = vmatpush3.msra.mxu0 %v414_v18  ;;  %v404_v48 = vld [vmem:[%s1367_s2] sm:$0xff] }
  0x12   :  { %864 = vmatprep.subr.mxu0 %v413_v20  ;;  %936 = vmatprep.subr.mxu1 %v415_v16 }
  0x13   :  { %865 = vmatpush3.msra.mxu0 %v413_v20  ;;  %952 = vmatpush3.msra.mxu1 %v415_v16 }
  0x14   :  { %817 = vmatmul.mubr.msk.f32.gmra.mxu0 %vm50_vm0, %v26_v13  ;;  %937 = vmatprep.subr.mxu1 %v414_v18 }
  0x15   :  { %819 = vmatprep.mubr.msk.f32.mxu0 %vm50_vm0, %v27_v15  ;;  %953 = vmatpush3.msra.mxu1 %v414_v18 }
  0x16   :  { %938 = vmatprep.subr.mxu1 %v413_v20  ;;  %866 = vmatprep.subr.mxu0 %v412_v40 }
  0x17   :  { %954 = vmatpush3.msra.mxu1 %v413_v20  ;;  %867 = vmatpush3.msra.mxu0 %v412_v40 }
  0x18   :  { %820 = vmatmul.mubr.msk.f32.gmra.mxu0 %vm50_vm0, %v28_v17  ;;  %939 = vmatprep.subr.mxu1 %v412_v40 }
  0x19   :  { %822 = vmatprep.mubr.msk.f32.mxu0 %vm50_vm0, %v29_v19  ;;  %955 = vmatpush3.msra.mxu1 %v412_v40 }
  0x1a   :  { %868 = vmatprep.subr.mxu0 %v411_v41  ;;  %940 = vmatprep.subr.mxu1 %v411_v41 }
  0x1b   :  { %869 = vmatpush3.msra.mxu0 %v411_v41  ;;  %956 = vmatpush3.msra.mxu1 %v411_v41 }
  0x1c   :  { %823 = vmatmul.mubr.msk.f32.gmra.mxu0 %vm50_vm0, %v30_v21  ;;  %870 = vmatprep.subr.mxu0 %v410_v42 }
  0x1d   :  { %825 = vmatprep.mubr.msk.f32.mxu0 %vm50_vm0, %v31_v22  ;;  %941 = vmatprep.subr.mxu1 %v410_v42 }
  0x1e   :  { %871 = vmatpush3.msra.mxu0 %v410_v42  ;;  %957 = vmatpush3.msra.mxu1 %v410_v42 }
  0x1f   :  { %872 = vmatprep.subr.mxu0 %v409_v43  ;;  %942 = vmatprep.subr.mxu1 %v409_v43 }
  0x20   :  { %826 = vmatmul.mubr.msk.f32.gmra.mxu0 %vm50_vm0, %v32_v23  ;;  %958 = vmatpush3.msra.mxu1 %v409_v43 }
  0x21   :  { %828 = vmatprep.mubr.msk.f32.mxu0 %vm50_vm0, %v33_v24  ;;  %873 = vmatpush3.msra.mxu0 %v409_v43 }
  0x22   :  { %874 = vmatprep.subr.mxu0 %v408_v44  ;;  %943 = vmatprep.subr.mxu1 %v408_v44 }
  0x23   :  { %875 = vmatpush3.msra.mxu0 %v408_v44  ;;  %959 = vmatpush3.msra.mxu1 %v408_v44 }
  0x24   :  { %829 = vmatmul.mubr.msk.f32.gmra.mxu0 %vm50_vm0, %v34_v25  ;;  %876 = vmatprep.subr.mxu0 %v407_v45 }
  0x25   :  { %831 = vmatprep.mubr.msk.f32.mxu0 %vm50_vm0, %v35_v26  ;;  %944 = vmatprep.subr.mxu1 %v407_v45 }
  0x26   :  { %877 = vmatpush3.msra.mxu0 %v407_v45  ;;  %960 = vmatpush3.msra.mxu1 %v407_v45 }
  0x27   :  { %878 = vmatprep.subr.mxu0 %v406_v46  ;;  %945 = vmatprep.subr.mxu1 %v406_v46 }
  0x28   :  { %832 = vmatmul.mubr.msk.f32.gmra.mxu0 %vm50_vm0, %v36_v27  ;;  %961 = vmatpush3.msra.mxu1 %v406_v46 }
  0x29   :  { %834 = vmatprep.mubr.msk.f32.mxu0 %vm50_vm0, %v37_v28  ;;  %879 = vmatpush3.msra.mxu0 %v406_v46 }
  0x2a   :  { %880 = vmatprep.subr.mxu0 %v405_v47  ;;  %946 = vmatprep.subr.mxu1 %v405_v47 }
  0x2b   :  { %881 = vmatpush3.msra.mxu0 %v405_v47  ;;  %962 = vmatpush3.msra.mxu1 %v405_v47 }
  0x2c   :  { %835 = vmatmul.mubr.msk.f32.gmra.mxu0 %vm50_vm0, %v38_v29  ;;  %882 = vmatprep.subr.mxu0 %v404_v48 }
  0x2d   :  { %837 = vmatprep.mubr.msk.f32.mxu0 %vm50_vm0, %v39_v30  ;;  %947 = vmatprep.subr.mxu1 %v404_v48 }
  0x2e   :  { %883 = vmatpush3.msra.mxu0 %v404_v48  ;;  %963 = vmatpush3.msra.mxu1 %v404_v48 }
  0x30   :  { %838 = vmatmul.mubr.msk.f32.gmra.mxu0 %vm50_vm0, %v40_v31 }
  0x31   :  { %840 = vmatprep.mubr.msk.f32.mxu0 %vm50_vm0, %v41_v32 }
  0x34   :  { %841 = vmatmul.mubr.msk.f32.gmra.mxu0 %vm50_vm0, %v42_v33 }
  0x35   :  { %843 = vmatprep.mubr.msk.f32.mxu0 %vm50_vm0, %v43_v34 }
  0x38   :  { %844 = vmatmul.mubr.msk.f32.gmra.mxu0 %vm50_vm0, %v44_v35 }
  0x39   :  { %846 = vmatprep.mubr.msk.f32.mxu0 %vm50_vm0, %v45_v36 }
  0x3c   :  { %847 = vmatmul.mubr.msk.f32.gmra.mxu0 %vm50_vm0, %v46_v37 }
  0x3d   :  { %849 = vmatprep.mubr.msk.f32.mxu0 %vm50_vm0, %v47_v38 }
  0x40   :  { %850 = vmatmul.mubr.msk.f32.gmra.mxu0 %vm50_vm0, %v48_v39 }
  0xc4   :  { %v806_v49 = vpop.f32.mrf.mxu0 }
  0xc6   :  { %v213_v50 = vpop.f32.mrf.mxu0 }
  0xc7   :  { %964 = vtanh.f32 %v213_v50 }
  0xc8   :  { %966 = vtanh.f32 %v806_v49  ;;  %v809_v51 = vpop.f32.mrf.mxu0  ;;  %v1235_v49 = vld [vmem:[%s1368_s3] ss:$0 sm:$0xff] }
  0xca   :  { %v223_v52 = vpop.f32.mrf.mxu0 }
  0xcb   :  { %968 = vtanh.f32 %v223_v52 }
  0xcc   :  { %970 = vtanh.f32 %v809_v51  ;;  %v812_v53 = vpop.f32.mrf.mxu0 }
  0xce   :  { %v233_v54 = vpop.f32.mrf.mxu0 }
  0xcf   :  { %972 = vtanh.f32 %v233_v54 }
  0xd0   :  { %974 = vtanh.f32 %v812_v53  ;;  %v815_v55 = vpop.f32.mrf.mxu0 }
  0xd2   :  { %v243_v56 = vpop.f32.mrf.mxu0 }
  0xd3   :  { %976 = vtanh.f32 %v243_v56 }
  0xd4   :  { %v965_v57 = vpop.eup %964  ;;  %978 = vtanh.f32 %v815_v55  ;;  %v818_v58 = vpop.f32.mrf.mxu0 }
  0xd5   :  { %v967_v59 = vpop.eup %966  ;;  %884 = vmatprep.mubr.f32.mxu0 %v965_v57 }
  0xd6   :  { %v253_v60 = vpop.f32.mrf.mxu0  ;;  %885 = vmatmul.mubr.f32.vlgmr.msra.gmra.mxu0 %v967_v59 }
  0xd7   :  { %980 = vtanh.f32 %v253_v60 }
  0xd8   :  { %v969_v61 = vpop.eup %968  ;;  %982 = vtanh.f32 %v818_v58  ;;  %v821_v62 = vpop.f32.mrf.mxu0 }
  0xd9   :  { %v971_v63 = vpop.eup %970  ;;  %887 = vmatprep.mubr.f32.mxu0 %v969_v61 }
  0xda   :  { %v263_v0 = vpop.f32.mrf.mxu0  ;;  %888 = vmatmul.mubr.f32.gmra.mxu0 %v971_v63 }
  0xdb   :  { %984 = vtanh.f32 %v263_v0 }
  0xdc   :  { %v973_v1 = vpop.eup %972  ;;  %986 = vtanh.f32 %v821_v62  ;;  %v824_v2 = vpop.f32.mrf.mxu0 }
  0xdd   :  { %v975_v3 = vpop.eup %974  ;;  %890 = vmatprep.mubr.f32.mxu0 %v973_v1 }
  0xde   :  { %v273_v4 = vpop.f32.mrf.mxu0  ;;  %891 = vmatmul.mubr.f32.gmra.mxu0 %v975_v3 }
  0xdf   :  { %988 = vtanh.f32 %v273_v4 }
  0xe0   :  { %v977_v5 = vpop.eup %976  ;;  %990 = vtanh.f32 %v824_v2  ;;  %v827_v6 = vpop.f32.mrf.mxu0 }
  0xe1   :  { %v979_v7 = vpop.eup %978  ;;  %893 = vmatprep.mubr.f32.mxu1 %v977_v5 }
  0xe2   :  { %v283_v8 = vpop.f32.mrf.mxu0  ;;  %894 = vmatmul.mubr.f32.vlgmr.msra.gmra.mxu1 %v979_v7 }
  0xe3   :  { %992 = vtanh.f32 %v283_v8 }
  0xe4   :  { %v981_v9 = vpop.eup %980  ;;  %994 = vtanh.f32 %v827_v6  ;;  %v830_v10 = vpop.f32.mrf.mxu0 }
  0xe5   :  { %v983_v11 = vpop.eup %982  ;;  %896 = vmatprep.mubr.f32.mxu1 %v981_v9 }
  0xe6   :  { %v293_v12 = vpop.f32.mrf.mxu0  ;;  %897 = vmatmul.mubr.f32.gmra.mxu1 %v983_v11 }
  0xe7   :  { %996 = vtanh.f32 %v293_v12 }
  0xe8   :  { %v985_v13 = vpop.eup %984  ;;  %998 = vtanh.f32 %v830_v10  ;;  %v833_v14 = vpop.f32.mrf.mxu0 }
  0xe9   :  { %v987_v15 = vpop.eup %986  ;;  %899 = vmatprep.mubr.f32.mxu1 %v985_v13 }
  0xea   :  { %v303_v16 = vpop.f32.mrf.mxu0  ;;  %900 = vmatmul.mubr.f32.gmra.mxu1 %v987_v15 }
  0xeb   :  { %1000 = vtanh.f32 %v303_v16 }
  0xec   :  { %v989_v17 = vpop.eup %988  ;;  %1002 = vtanh.f32 %v833_v14  ;;  %v836_v18 = vpop.f32.mrf.mxu0 }
  0xed   :  { %v991_v19 = vpop.eup %990  ;;  %902 = vmatprep.mubr.f32.mxu1 %v989_v17 }
  0xee   :  { %v313_v20 = vpop.f32.mrf.mxu0  ;;  %903 = vmatmul.mubr.f32.gmra.mxu1 %v991_v19 }
  0xef   :  { %1004 = vtanh.f32 %v313_v20 }
  0xf0   :  { %v993_v21 = vpop.eup %992  ;;  %1006 = vtanh.f32 %v836_v18  ;;  %v839_v22 = vpop.f32.mrf.mxu0 }
  0xf1   :  { %v995_v23 = vpop.eup %994  ;;  %905 = vmatprep.mubr.f32.mxu1 %v993_v21 }
  0xf2   :  { %v323_v24 = vpop.f32.mrf.mxu0  ;;  %906 = vmatmul.mubr.f32.gmra.mxu1 %v995_v23 }
  0xf3   :  { %1008 = vtanh.f32 %v323_v24 }
  0xf4   :  { %v997_v25 = vpop.eup %996  ;;  %1010 = vtanh.f32 %v839_v22  ;;  %v842_v26 = vpop.f32.mrf.mxu0 }
  0xf5   :  { %v999_v27 = vpop.eup %998  ;;  %908 = vmatprep.mubr.f32.mxu1 %v997_v25 }
  0xf6   :  { %v333_v28 = vpop.f32.mrf.mxu0  ;;  %909 = vmatmul.mubr.f32.gmra.mxu1 %v999_v27 }
  0xf7   :  { %1012 = vtanh.f32 %v333_v28 }
  0xf8   :  { %v1001_v29 = vpop.eup %1000  ;;  %1014 = vtanh.f32 %v842_v26  ;;  %v845_v30 = vpop.f32.mrf.mxu0 }
  0xf9   :  { %v1003_v31 = vpop.eup %1002  ;;  %911 = vmatprep.mubr.f32.mxu1 %v1001_v29 }
  0xfa   :  { %v343_v32 = vpop.f32.mrf.mxu0  ;;  %912 = vmatmul.mubr.f32.gmra.mxu1 %v1003_v31 }
  0xfb   :  { %1016 = vtanh.f32 %v343_v32 }
  0xfc   :  { %v1005_v33 = vpop.eup %1004  ;;  %1018 = vtanh.f32 %v845_v30  ;;  %v848_v34 = vpop.f32.mrf.mxu0 }
  0xfd   :  { %v1007_v35 = vpop.eup %1006  ;;  %914 = vmatprep.mubr.f32.mxu1 %v1005_v33 }
  0xfe   :  { %v353_v36 = vpop.f32.mrf.mxu0  ;;  %915 = vmatmul.mubr.f32.gmra.mxu1 %v1007_v35 }
  0xff   :  { %1020 = vtanh.f32 %v353_v36 }
 0x100   :  { %v1009_v37 = vpop.eup %1008  ;;  %1022 = vtanh.f32 %v848_v34  ;;  %v851_v38 = vpop.f32.mrf.mxu0 }
 0x101   :  { %v1011_v39 = vpop.eup %1010  ;;  %917 = vmatprep.mubr.f32.mxu1 %v1009_v37 }
 0x102   :  { %v363_v40 = vpop.f32.mrf.mxu0  ;;  %918 = vmatmul.mubr.f32.gmra.mxu1 %v1011_v39 }
 0x103   :  { %1024 = vtanh.f32 %v363_v40 }
 0x104   :  { %v1013_v41 = vpop.eup %1012  ;;  %1026 = vtanh.f32 %v851_v38 }
 0x105   :  { %v1015_v42 = vpop.eup %1014  ;;  %920 = vmatprep.mubr.f32.mxu1 %v1013_v41 }
 0x106   :  { %921 = vmatmul.mubr.f32.gmra.mxu1 %v1015_v42 }
 0x108   :  { %v1017_v43 = vpop.eup %1016 }
 0x109   :  { %v1019_v44 = vpop.eup %1018  ;;  %923 = vmatprep.mubr.f32.mxu1 %v1017_v43 }
 0x10a   :  { %924 = vmatmul.mubr.f32.gmra.mxu1 %v1019_v44 }
 0x10c   :  { %v1021_v45 = vpop.eup %1020 }
 0x10d   :  { %v1023_v46 = vpop.eup %1022  ;;  %926 = vmatprep.mubr.f32.mxu1 %v1021_v45 }
 0x10e   :  { %927 = vmatmul.mubr.f32.gmra.mxu1 %v1023_v46 }
 0x110   :  { %v1025_v47 = vpop.eup %1024 }
 0x111   :  { %v1027_v48 = vpop.eup %1026  ;;  %929 = vmatprep.mubr.f32.mxu1 %v1025_v47 }
 0x112   :  { %930 = vmatmul.mubr.f32.gmra.mxu1 %v1027_v48 }
 0x196   :  { %v886_v50 = vpop.f32.mrf.mxu0 }
 0x197   :  { %v499_v51 = vadd.f32 %v886_v50, %v1235_v49 }
 0x198   :  { %v493_v52 = vpop.f32.mrf.mxu0 }
 0x199   :  { %653 = vst [vmem:[%s1369_s4 + $0x8] sm:$0xff] %v499_v51  ;;  %v494_v53 = vadd.f32 %v1235_v49, %v493_v52 }
 0x19a   :  { %v889_v54 = vpop.f32.mrf.mxu0 }
 0x19b   :  { %652 = vst [vmem:[%s1369_s4] sm:$0xff] %v494_v53  ;;  %v509_v55 = vadd.f32 %v889_v54, %v1235_v49 }
 0x19c   :  { %v503_v56 = vpop.f32.mrf.mxu0 }
 0x19d   :  { %655 = vst [vmem:[%s1369_s4 + $0x18] sm:$0xff] %v509_v55  ;;  %v504_v57 = vadd.f32 %v1235_v49, %v503_v56 }
 0x19e   :  { %v892_v58 = vpop.f32.mrf.mxu0 }
 0x19f   :  { %654 = vst [vmem:[%s1369_s4 + $0x10] sm:$0xff] %v504_v57  ;;  %v519_v59 = vadd.f32 %v892_v58, %v1235_v49 }
 0x1a0   :  { %v513_v60 = vpop.f32.mrf.mxu0 }
 0x1a1   :  { %657 = vst [vmem:[%s1369_s4 + $0x28] sm:$0xff] %v519_v59  ;;  %v514_v61 = vadd.f32 %v1235_v49, %v513_v60 }
 0x1a2   :  { %v895_v62 = vpop.f32.mrf.mxu1 }
 0x1a3   :  { %656 = vst [vmem:[%s1369_s4 + $0x20] sm:$0xff] %v514_v61  ;;  %v529_v63 = vadd.f32 %v895_v62, %v1235_v49 }
 0x1a4   :  { %v523_v0 = vpop.f32.mrf.mxu1 }
 0x1a5   :  { %659 = vst [vmem:[%s1369_s4 + $0x38] sm:$0xff] %v529_v63  ;;  %v524_v1 = vadd.f32 %v1235_v49, %v523_v0 }
 0x1a6   :  { %v898_v2 = vpop.f32.mrf.mxu1 }
 0x1a7   :  { %658 = vst [vmem:[%s1369_s4 + $0x30] sm:$0xff] %v524_v1  ;;  %v539_v3 = vadd.f32 %v898_v2, %v1235_v49 }
 0x1a8   :  { %v533_v4 = vpop.f32.mrf.mxu1 }
 0x1a9   :  { %661 = vst [vmem:[%s1369_s4 + $0x48] sm:$0xff] %v539_v3  ;;  %v534_v5 = vadd.f32 %v1235_v49, %v533_v4 }
 0x1aa   :  { %v901_v6 = vpop.f32.mrf.mxu1 }
 0x1ab   :  { %660 = vst [vmem:[%s1369_s4 + $0x40] sm:$0xff] %v534_v5  ;;  %v549_v7 = vadd.f32 %v901_v6, %v1235_v49 }
 0x1ac   :  { %v543_v8 = vpop.f32.mrf.mxu1 }
 0x1ad   :  { %663 = vst [vmem:[%s1369_s4 + $0x58] sm:$0xff] %v549_v7  ;;  %v544_v9 = vadd.f32 %v1235_v49, %v543_v8 }
 0x1ae   :  { %v904_v10 = vpop.f32.mrf.mxu1 }
 0x1af   :  { %662 = vst [vmem:[%s1369_s4 + $0x50] sm:$0xff] %v544_v9  ;;  %v559_v11 = vadd.f32 %v904_v10, %v1235_v49 }
 0x1b0   :  { %v553_v12 = vpop.f32.mrf.mxu1 }
 0x1b1   :  { %665 = vst [vmem:[%s1369_s4 + $0x68] sm:$0xff] %v559_v11  ;;  %v554_v13 = vadd.f32 %v1235_v49, %v553_v12 }
 0x1b2   :  { %v907_v14 = vpop.f32.mrf.mxu1 }
 0x1b3   :  { %664 = vst [vmem:[%s1369_s4 + $0x60] sm:$0xff] %v554_v13  ;;  %v569_v15 = vadd.f32 %v907_v14, %v1235_v49 }
 0x1b4   :  { %v563_v16 = vpop.f32.mrf.mxu1 }
 0x1b5   :  { %667 = vst [vmem:[%s1369_s4 + $0x78] sm:$0xff] %v569_v15  ;;  %v564_v17 = vadd.f32 %v1235_v49, %v563_v16 }
 0x1b6   :  { %v910_v18 = vpop.f32.mrf.mxu1 }
 0x1b7   :  { %666 = vst [vmem:[%s1369_s4 + $0x70] sm:$0xff] %v564_v17  ;;  %v579_v19 = vadd.f32 %v910_v18, %v1235_v49 }
 0x1b8   :  { %v573_v20 = vpop.f32.mrf.mxu1 }
 0x1b9   :  { %669 = vst [vmem:[%s1369_s4 + $0x88] sm:$0xff] %v579_v19  ;;  %v574_v21 = vadd.f32 %v1235_v49, %v573_v20 }
 0x1ba   :  { %v913_v22 = vpop.f32.mrf.mxu1 }
 0x1bb   :  { %668 = vst [vmem:[%s1369_s4 + $0x80] sm:$0xff] %v574_v21  ;;  %v589_v23 = vadd.f32 %v913_v22, %v1235_v49 }
 0x1bc   :  { %v583_v24 = vpop.f32.mrf.mxu1 }
 0x1bd   :  { %671 = vst [vmem:[%s1369_s4 + $0x98] sm:$0xff] %v589_v23  ;;  %v584_v25 = vadd.f32 %v1235_v49, %v583_v24 }
 0x1be   :  { %v916_v26 = vpop.f32.mrf.mxu1 }
 0x1bf   :  { %670 = vst [vmem:[%s1369_s4 + $0x90] sm:$0xff] %v584_v25  ;;  %v599_v27 = vadd.f32 %v916_v26, %v1235_v49 }
 0x1c0   :  { %v593_v28 = vpop.f32.mrf.mxu1 }
 0x1c1   :  { %673 = vst [vmem:[%s1369_s4 + $0xa8] sm:$0xff] %v599_v27  ;;  %v594_v29 = vadd.f32 %v1235_v49, %v593_v28 }
 0x1c2   :  { %v919_v30 = vpop.f32.mrf.mxu1 }
 0x1c3   :  { %672 = vst [vmem:[%s1369_s4 + $0xa0] sm:$0xff] %v594_v29  ;;  %v609_v31 = vadd.f32 %v919_v30, %v1235_v49 }
 0x1c4   :  { %v603_v32 = vpop.f32.mrf.mxu1 }
 0x1c5   :  { %675 = vst [vmem:[%s1369_s4 + $0xb8] sm:$0xff] %v609_v31  ;;  %v604_v33 = vadd.f32 %v1235_v49, %v603_v32 }
 0x1c6   :  { %v922_v34 = vpop.f32.mrf.mxu1 }
 0x1c7   :  { %674 = vst [vmem:[%s1369_s4 + $0xb0] sm:$0xff] %v604_v33  ;;  %v619_v35 = vadd.f32 %v922_v34, %v1235_v49 }
 0x1c8   :  { %v613_v36 = vpop.f32.mrf.mxu1 }
 0x1c9   :  { %677 = vst [vmem:[%s1369_s4 + $0xc8] sm:$0xff] %v619_v35  ;;  %v614_v37 = vadd.f32 %v1235_v49, %v613_v36 }
 0x1ca   :  { %v925_v38 = vpop.f32.mrf.mxu1 }
 0x1cb   :  { %676 = vst [vmem:[%s1369_s4 + $0xc0] sm:$0xff] %v614_v37  ;;  %v629_v39 = vadd.f32 %v925_v38, %v1235_v49 }
 0x1cc   :  { %v623_v40 = vpop.f32.mrf.mxu1 }
 0x1cd   :  { %679 = vst [vmem:[%s1369_s4 + $0xd8] sm:$0xff] %v629_v39  ;;  %v624_v41 = vadd.f32 %v1235_v49, %v623_v40 }
 0x1ce   :  { %v928_v42 = vpop.f32.mrf.mxu1 }
 0x1cf   :  { %678 = vst [vmem:[%s1369_s4 + $0xd0] sm:$0xff] %v624_v41  ;;  %v639_v43 = vadd.f32 %v928_v42, %v1235_v49 }
 0x1d0   :  { %v633_v44 = vpop.f32.mrf.mxu1 }
 0x1d1   :  { %681 = vst [vmem:[%s1369_s4 + $0xe8] sm:$0xff] %v639_v43  ;;  %v634_v45 = vadd.f32 %v1235_v49, %v633_v44 }
 0x1d2   :  { %v931_v46 = vpop.f32.mrf.mxu1 }
 0x1d3   :  { %680 = vst [vmem:[%s1369_s4 + $0xe0] sm:$0xff] %v634_v45  ;;  %v649_v47 = vadd.f32 %v931_v46, %v1235_v49 }
 0x1d4   :  { %v643_v48 = vpop.f32.mrf.mxu1 }
 0x1d5   :  { %683 = vst [vmem:[%s1369_s4 + $0xf8] sm:$0xff] %v649_v47  ;;  %v644_v50 = vadd.f32 %v1235_v49, %v643_v48 }
 0x1d7   :  { %682 = vst [vmem:[%s1369_s4 + $0xf0] sm:$0xff] %v644_v50 }

</bundles_post_ra>
